<compile_context>
chip_gen: v5e
topology: v5e:2x2
jax: 0.10.0
libtpu: 0.0.40
codegen_flags: <defaults>
</compile_context>

<pallas_src>
import jax
import jax.numpy as jnp
from jax.experimental import pallas as pl
from jax.experimental.pallas import tpu as pltpu

IN_DIM = 40
HID_DIM = IN_DIM // 2      # 20
OUT_DIM = HID_DIM // 2     # 10


def _encoder_kernel(x_ref, w1_ref, b1_ref, w2_ref, b2_ref, ot_ref):
    # x_ref: (TB, 40)   w1_ref: (20, 40)   b1_ref: (20, 1)
    # w2_ref: (10, 20)  b2_ref: (10, 1)    ot_ref: (10, TB)
    x = x_ref[...]
    # Contract the feature dim of both operands: (20,40) x (TB,40) -> (20,TB).
    # Keeps batch on lanes without any wrapper-side transpose of x.
    h = jnp.einsum("hd,bd->hb", w1_ref[...], x,
                   preferred_element_type=jnp.float32) + b1_ref[...]
    h = jnp.maximum(h, 0.0)                                   # ReLU after layer 1 only
    out = jnp.dot(w2_ref[...], h, preferred_element_type=jnp.float32) + b2_ref[...]
    ot_ref[...] = out.astype(ot_ref.dtype)


def _round_up(n, m):
    return ((n + m - 1) // m) * m


def linear_encoder(x, w1, b1, w2, b2, *, batch_tile=8192, transpose_output=True):
    """x: (B, 40) f32; w1: (20, 40); b1: (20,); w2: (10, 20); b2: (10,)."""
    B, D = x.shape
    assert D == IN_DIM

    # Tile: multiple of 128 (lane alignment only needs 128), capped for small
    # batches so we don't over-allocate.  Default 8192 amortizes per-step
    # overhead while keeping the lane-padded (tile,128) f32 input buffer
    # (tile*512 B, double-buffered) within v5e's default scoped VMEM.
    tile = min(_round_up(batch_tile, 128), _round_up(B, 128))
    grid = (pl.cdiv(B, tile),)                                # ragged; no padding pass

    # Glue (cheap layout plumbing only — no full-array transpose/pad of x).
    xf = jnp.asarray(x, jnp.float32)                          # (B, 40)
    w1f = jnp.asarray(w1, jnp.float32)                        # (20, 40)
    w2f = jnp.asarray(w2, jnp.float32)                        # (10, 20)
    b1c = jnp.asarray(b1, jnp.float32)[:, None]               # (20, 1)
    b2c = jnp.asarray(b2, jnp.float32)[:, None]               # (10, 1)

    out_t = pl.pallas_call(
        _encoder_kernel,
        out_shape=jax.ShapeDtypeStruct((OUT_DIM, B), xf.dtype),
        grid_spec=pl.GridSpec(
            grid=grid,
            in_specs=[
                pl.BlockSpec((tile, IN_DIM), lambda i: (i, 0)),     # x tile, native layout
                pl.BlockSpec((HID_DIM, IN_DIM), lambda i: (0, 0)),  # W1 (resident)
                pl.BlockSpec((HID_DIM, 1), lambda i: (0, 0)),       # b1
                pl.BlockSpec((OUT_DIM, HID_DIM), lambda i: (0, 0)), # W2 (resident)
                pl.BlockSpec((OUT_DIM, 1), lambda i: (0, 0)),       # b2
            ],
            out_specs=pl.BlockSpec((OUT_DIM, tile), lambda i: (0, i)),  # lane-dense out
        ),
        compiler_params=pltpu.CompilerParams(
            dimension_semantics=("parallel",)),                 # shards grid across TCs on v7x
    )(xf, w1f, b1c, w2f, b2c)

    # (10, B) -> (B, 10) to match PyTorch; skip if the consumer accepts (10, B).
    return out_t.T if transpose_output else out_t


def _reference(x, w1, b1, w2, b2):
    h = jnp.maximum(x @ w1.T + b1, 0.0)
    return h @ w2.T + b2


if __name__ == "__main__":
    key = jax.random.PRNGKey(0)
    kx, kw1, kb1, kw2, kb2 = jax.random.split(key, 5)

    # Deterministic synthetic parameters (PyTorch Linear shapes: (out, in), (out,)).
    w1 = jax.random.normal(kw1, (HID_DIM, IN_DIM), dtype=jnp.float32) * 0.1
    b1 = jax.random.normal(kb1, (HID_DIM,), dtype=jnp.float32) * 0.1
    w2 = jax.random.normal(kw2, (OUT_DIM, HID_DIM), dtype=jnp.float32) * 0.1
    b2 = jax.random.normal(kb2, (OUT_DIM,), dtype=jnp.float32) * 0.1

    # Small batch (single partial block).
    B = 8
    x = jax.random.normal(kx, (B, IN_DIM), dtype=jnp.float32)
    out = jax.block_until_ready(linear_encoder(x, w1, b1, w2, b2))
    ref = _reference(x, w1, b1, w2, b2)
    assert out.shape == (B, OUT_DIM)
    assert jnp.allclose(out, ref, atol=1e-5, rtol=1e-5), "mismatch vs reference (B=8)"

    # Ragged multi-tile case: grid of 3 with a clipped last block, no padding.
    B2 = 333
    x2 = jax.random.normal(kx, (B2, IN_DIM), dtype=jnp.float32)
    out2 = jax.block_until_ready(linear_encoder(x2, w1, b1, w2, b2, batch_tile=128))
    ref2 = _reference(x2, w1, b1, w2, b2)
    assert out2.shape == (B2, OUT_DIM)
    assert jnp.allclose(out2, ref2, atol=1e-5, rtol=1e-5), "mismatch vs reference (B=333)"

    print("KERNEL_OK")
</pallas_src>

<mosaic_0001>
module attributes {stable_mosaic.version = 11 : i64} {
  func.func @_encoder_kernel(%arg0: i32, %arg1: memref<128x40xf32, #tpu.memory_space<vmem>>, %arg2: memref<20x40xf32, #tpu.memory_space<vmem>>, %arg3: memref<20x1xf32, #tpu.memory_space<vmem>>, %arg4: memref<10x20xf32, #tpu.memory_space<vmem>>, %arg5: memref<10x1xf32, #tpu.memory_space<vmem>>, %arg6: memref<10x128xf32, #tpu.memory_space<vmem>>) attributes {dimension_semantics = [#tpu.dimension_semantics<parallel>], iteration_bounds = array<i64: 1>, scalar_prefetch = 0 : i64, scratch_operands = 0 : i64, tpu.core_type = #tpu.core_type<tc>, window_params = [{transform_indices = @transform_0, window_bounds = array<i64: 128, 40>}, {pipeline_mode = #tpu.pipeline_mode<synchronous>, transform_indices = @transform_1, window_bounds = array<i64: 20, 40>}, {pipeline_mode = #tpu.pipeline_mode<synchronous>, transform_indices = @transform_2, window_bounds = array<i64: 20, 1>}, {pipeline_mode = #tpu.pipeline_mode<synchronous>, transform_indices = @transform_3, window_bounds = array<i64: 10, 20>}, {pipeline_mode = #tpu.pipeline_mode<synchronous>, transform_indices = @transform_4, window_bounds = array<i64: 10, 1>}, {transform_indices = @transform_5, window_bounds = array<i64: 10, 128>}]} {
    %c0 = arith.constant 0 : index
    %c0_0 = arith.constant 0 : index
    %0 = vector.load %arg1[%c0, %c0_0] : memref<128x40xf32, #tpu.memory_space<vmem>>, vector<128x40xf32>
    %c0_1 = arith.constant 0 : index
    %c0_2 = arith.constant 0 : index
    %1 = vector.load %arg2[%c0_1, %c0_2] : memref<20x40xf32, #tpu.memory_space<vmem>>, vector<20x40xf32>
    "tpu.trace_start"() <{level = 10 : i32, message = "hd,bd->hb"}> : () -> ()
    %cst = arith.constant dense<0.000000e+00> : vector<20x128xf32>
    %2 = tpu.matmul %1, %0, %cst {dimension_numbers = #tpu.dot_dimension_numbers<[1], [1], [0], [0], [0, 0, 1, 0], [], []>} : vector<20x40xf32>, vector<128x40xf32>, vector<20x128xf32> -> vector<20x128xf32>
    "tpu.trace_stop"() : () -> ()
    %c0_3 = arith.constant 0 : index
    %c0_4 = arith.constant 0 : index
    %3 = vector.load %arg3[%c0_3, %c0_4] : memref<20x1xf32, #tpu.memory_space<vmem>>, vector<20x1xf32>
    %4 = vector.broadcast %3 : vector<20x1xf32> to vector<20x128xf32>
    %5 = arith.addf %2, %4 : vector<20x128xf32>
    %cst_5 = arith.constant 0.000000e+00 : f32
    %6 = vector.broadcast %cst_5 : f32 to vector<20x128xf32>
    %7 = arith.maximumf %5, %6 : vector<20x128xf32>
    %c0_6 = arith.constant 0 : index
    %c0_7 = arith.constant 0 : index
    %8 = vector.load %arg4[%c0_6, %c0_7] : memref<10x20xf32, #tpu.memory_space<vmem>>, vector<10x20xf32>
    %cst_8 = arith.constant dense<0.000000e+00> : vector<10x128xf32>
    %9 = tpu.matmul %8, %7, %cst_8 {dimension_numbers = #tpu.dot_dimension_numbers<[1], [0], [0], [1], [0, 0, 1, 1], [], []>} : vector<10x20xf32>, vector<20x128xf32>, vector<10x128xf32> -> vector<10x128xf32>
    %c0_9 = arith.constant 0 : index
    %c0_10 = arith.constant 0 : index
    %10 = vector.load %arg5[%c0_9, %c0_10] : memref<10x1xf32, #tpu.memory_space<vmem>>, vector<10x1xf32>
    %11 = vector.broadcast %10 : vector<10x1xf32> to vector<10x128xf32>
    %12 = arith.addf %9, %11 : vector<10x128xf32>
    %c0_11 = arith.constant 0 : index
    %c0_12 = arith.constant 0 : index
    %13 = vector.load %arg6[%c0_11, %c0_12] : memref<10x128xf32, #tpu.memory_space<vmem>>, vector<10x128xf32>
    tpu.vector_store %arg6[%c0_11, %c0_12], %12 {strides = array<i32>} : memref<10x128xf32, #tpu.memory_space<vmem>>, vector<10x128xf32>,
    return
  }
  func.func @transform_0(%arg0: i32) -> (i32, i32) {
    %c0_i32 = arith.constant 0 : i32
    %c0_i32_0 = arith.constant 0 : i32
    return %arg0, %c0_i32 : i32, i32
  }
  func.func @transform_1(%arg0: i32) -> (i32, i32) {
    %c0_i32 = arith.constant 0 : i32
    %c0_i32_0 = arith.constant 0 : i32
    %c0_i32_1 = arith.constant 0 : i32
    return %c0_i32, %c0_i32_0 : i32, i32
  }
  func.func @transform_2(%arg0: i32) -> (i32, i32) {
    %c0_i32 = arith.constant 0 : i32
    %c0_i32_0 = arith.constant 0 : i32
    %c0_i32_1 = arith.constant 0 : i32
    return %c0_i32, %c0_i32_0 : i32, i32
  }
  func.func @transform_3(%arg0: i32) -> (i32, i32) {
    %c0_i32 = arith.constant 0 : i32
    %c0_i32_0 = arith.constant 0 : i32
    %c0_i32_1 = arith.constant 0 : i32
    return %c0_i32, %c0_i32_0 : i32, i32
  }
  func.func @transform_4(%arg0: i32) -> (i32, i32) {
    %c0_i32 = arith.constant 0 : i32
    %c0_i32_0 = arith.constant 0 : i32
    %c0_i32_1 = arith.constant 0 : i32
    return %c0_i32, %c0_i32_0 : i32, i32
  }
  func.func @transform_5(%arg0: i32) -> (i32, i32) {
    %c0_i32 = arith.constant 0 : i32
    %c0_i32_0 = arith.constant 0 : i32
    return %c0_i32, %arg0 : i32, i32
  }
}

</mosaic_0001>

<bundles_post_ra>
// kernel: tpu_custom_call.1
= control target key start
LH: loop header
LB: loop body
LE: loop exit
PB: predicated region body
PF: predicated region fallthrough
CT: control target
= control target key end

     0   :  { %10 = vsyncpa [#allocation3], 0  ;;  %s426_s0 = inlined_call_operand.hbm [shape: f32[8,40], index: 0, kind: input, shape index: {}]   ;;  %s427_s1 = inlined_call_operand.vmem [shape: f32[20,40], index: 1, kind: input, shape index: {}]   ;;  %s428_s2 = inlined_call_operand.vmem [shape: f32[20,1], index: 2, kind: input, shape index: {}]   ;;  %s429_s3 = inlined_call_operand.vmem [shape: f32[10,20], index: 3, kind: input, shape index: {}]   ;;  %s430_s4 = inlined_call_operand.vmem [shape: f32[10,1], index: 4, kind: input, shape index: {}]   ;;  %s431_s5 = inlined_call_operand.vmem [shape: f32[10,8], index: 5, kind: output, shape index: {}]  }
   0x1   :  { %14 = vsyncadd [#allocation3], 1920  ;;  %s15_s20 = sshll.u32 %s426_s0, 4  ;;  %s302_s21 = smov [#allocation2]   ;;  %s16_s20 = int_to_ptr.hbm [resolvable:$true] %s15_s20 }
   0x2   :  { %s17_s22 = sshll.u32 %s302_s21, 4  ;;  %s303_s23 = smov 128   ;;  %s18_s22 = int_to_ptr.vmem [resolvable:$true] %s17_s22 }
   0x3   :  { %s304_s24 = smov 8  }
   0x4   :  { %23 = dma.hbm_to_vmem [thread:$0]  %s16_s20, 128, %s18_s22, [#allocation3], %s303_s23, %s303_s23, %s304_s24  }
   0x5   :  { %300 = dma.done.wait [#allocation3], 2048  }
   0x6   :  { %301 = vsyncadd [#allocation3], 4294965248  ;;  %vm73_vm0 = vcmask 326656   ;;  %v51_v0 = vld [vmem:[#allocation2 + $0x78] sm:$0xff]  ;;  %v50_v1 = vld [vmem:[#allocation2 + $0x70] sm:$0xff]  ;;  %v305_v12 = vmov 0  }
   0x7   :  { %237 = vmatpush.xpose.msk.msra.mxu2 %vm73_vm0, %v51_v0  ;;  %238 = vmatpush.xpose.msk.msra.mxu3 %vm73_vm0, %v51_v0  ;;  %v49_v2 = vld [vmem:[#allocation2 + $0x68] sm:$0xff]  ;;  %v48_v3 = vld [vmem:[#allocation2 + $0x60] sm:$0xff]  ;;  %v47_v4 = vld [vmem:[#allocation2 + $0x58] sm:$0xff]  ;;  %vm181_vm1 = vcmask 1043456   ;;  %vm174_vm2 = vcmask 162816  }
   0x8   :  { %215 = vmatpush.xpose.msk.msra.mxu0 %vm73_vm0, %v51_v0  ;;  %v46_v5 = vld [vmem:[#allocation2 + $0x50] sm:$0xff]  ;;  %v45_v6 = vld [vmem:[#allocation2 + $0x48] sm:$0xff]  ;;  %v44_v7 = vld [vmem:[#allocation2 + $0x40] sm:$0xff]  ;;  %273 = vset.pattern.permute.xlu0 %v305_v12 }
   0x9   :  { %v43_v8 = vld [vmem:[#allocation2 + $0x38] sm:$0xff]  ;;  %v57_v9 = vld [vmem:[%s428_s2 + $0x10] sm:$0xf]  ;;  %v55_v10 = vld [vmem:[%s428_s2] sm:$0xff]  ;;  %274 = vset.pattern.permute.xlu1 %v305_v12  ;;  %275 = vset.pattern.permute.xlu2 %v305_v12 }
   0xa   :  { %v42_v11 = vld [vmem:[#allocation2 + $0x30] sm:$0xff]  ;;  %70 = vperm.xlu0 %273, %v57_v9   ;;  %60 = vperm.xlu1 %274, %v55_v10   ;;  %v41_v13 = vld [vmem:[#allocation2 + $0x28] sm:$0xff]  ;;  %v162_v15 = vld [vmem:[%s430_s4] sm:$0xff] }
   0xb   :  { %239 = vmatpush.xpose.msk.msra.mxu2 %vm73_vm0, %v50_v1  ;;  %240 = vmatpush.xpose.msk.msra.mxu3 %vm73_vm0, %v50_v1  ;;  %v56_v14 = vld [vmem:[%s428_s2 + $0x8] sm:$0xff]  ;;  %v40_v16 = vld [vmem:[#allocation2 + $0x20] sm:$0xff]  ;;  %v39_v17 = vld [vmem:[#allocation2 + $0x18] sm:$0xff] }
   0xc   :  { %216 = vmatpush.xpose.msk.msra.mxu0 %vm73_vm0, %v50_v1  ;;  %v38_v18 = vld [vmem:[#allocation2 + $0x10] sm:$0xff]  ;;  %v37_v19 = vld [vmem:[#allocation2 + $0x8] sm:$0xff]  ;;  %v36_v20 = vld [vmem:[#allocation2] sm:$0xff] }
   0xd   :  { %v53_v21 = vld [vmem:[%s427_s1 + $0x8] sm:$0xff]  ;;  %v54_v22 = vld [vmem:[%s427_s1 + $0x10] sm:$0xf]  ;;  %v52_v23 = vld [vmem:[%s427_s1] sm:$0xff] }
   0xe   :  { %v163_v24 = vld [vmem:[%s430_s4 + $0x8] sm:$0x3]  ;;  %v160_v37 = vld [vmem:[%s429_s3] sm:$0xff] }
   0xf   :  { %241 = vmatpush.xpose.msk.msra.mxu2 %vm73_vm0, %v49_v2  ;;  %242 = vmatpush.xpose.msk.msra.mxu3 %vm73_vm0, %v49_v2  ;;  %v161_v38 = vld [vmem:[%s429_s3 + $0x8] sm:$0x3] }
  0x10   :  { %217 = vmatpush.xpose.msk.msra.mxu0 %vm73_vm0, %v49_v2  ;;  %171 = vperm.xlu2 %275, %v163_v24  }
  0x12   :  { %65 = vperm.xlu0 %273, %v56_v14   ;;  %166 = vperm.xlu1 %274, %v162_v15  }
  0x13   :  { %243 = vmatpush.xpose.msk.msra.mxu2 %vm73_vm0, %v48_v3  ;;  %244 = vmatpush.xpose.msk.msra.mxu3 %vm73_vm0, %v48_v3 }
  0x14   :  { %218 = vmatpush.xpose.msk.msra.mxu0 %vm73_vm0, %v48_v3 }
  0x17   :  { %245 = vmatpush.xpose.msk.msra.mxu2 %vm73_vm0, %v47_v4  ;;  %246 = vmatpush.xpose.msk.msra.mxu3 %vm73_vm0, %v47_v4 }
  0x18   :  { %219 = vmatpush.xpose.msk.msra.mxu0 %vm73_vm0, %v47_v4 }
  0x1b   :  { %247 = vmatpush.xpose.msk.msra.mxu2 %vm73_vm0, %v46_v5  ;;  %248 = vmatpush.xpose.msk.msra.mxu3 %vm73_vm0, %v46_v5 }
  0x1c   :  { %220 = vmatpush.xpose.msk.msra.mxu0 %vm73_vm0, %v46_v5 }
  0x1f   :  { %249 = vmatpush.xpose.msk.msra.mxu2 %vm73_vm0, %v45_v6  ;;  %250 = vmatpush.xpose.msk.msra.mxu3 %vm73_vm0, %v45_v6 }
  0x20   :  { %221 = vmatpush.xpose.msk.msra.mxu0 %vm73_vm0, %v45_v6 }
  0x23   :  { %251 = vmatpush.xpose.msk.msra.mxu2 %vm73_vm0, %v44_v7  ;;  %252 = vmatpush.xpose.msk.msra.mxu3 %vm73_vm0, %v44_v7 }
  0x24   :  { %222 = vmatpush.xpose.msk.msra.mxu0 %vm73_vm0, %v44_v7 }
  0x27   :  { %253 = vmatpush.xpose.msk.msra.mxu2 %vm73_vm0, %v43_v8  ;;  %254 = vmatpush.xpose.msk.msra.mxu3 %vm73_vm0, %v43_v8 }
  0x28   :  { %223 = vmatpush.xpose.msk.msra.mxu0 %vm73_vm0, %v43_v8 }
  0x2b   :  { %255 = vmatpush.xpose.msk.msra.mxu2 %vm73_vm0, %v42_v11  ;;  %256 = vmatpush.xpose.msk.msra.mxu3 %vm73_vm0, %v42_v11 }
  0x2c   :  { %224 = vmatpush.xpose.msk.msra.mxu0 %vm73_vm0, %v42_v11 }
  0x2f   :  { %257 = vmatpush.xpose.msk.msra.mxu2 %vm73_vm0, %v41_v13  ;;  %258 = vmatpush.xpose.msk.msra.mxu3 %vm73_vm0, %v41_v13 }
  0x30   :  { %225 = vmatpush.xpose.msk.msra.mxu0 %vm73_vm0, %v41_v13 }
  0x33   :  { %259 = vmatpush.xpose.msk.msra.mxu2 %vm73_vm0, %v40_v16  ;;  %260 = vmatpush.xpose.msk.msra.mxu3 %vm73_vm0, %v40_v16 }
  0x34   :  { %226 = vmatpush.xpose.msk.msra.mxu0 %vm73_vm0, %v40_v16 }
  0x37   :  { %261 = vmatpush.xpose.msk.msra.mxu2 %vm73_vm0, %v39_v17  ;;  %262 = vmatpush.xpose.msk.msra.mxu3 %vm73_vm0, %v39_v17 }
  0x38   :  { %227 = vmatpush.xpose.msk.msra.mxu0 %vm73_vm0, %v39_v17 }
  0x3b   :  { %263 = vmatpush.xpose.msk.msra.mxu2 %vm73_vm0, %v38_v18  ;;  %264 = vmatpush.xpose.msk.msra.mxu3 %vm73_vm0, %v38_v18 }
  0x3c   :  { %228 = vmatpush.xpose.msk.msra.mxu0 %vm73_vm0, %v38_v18 }
  0x3f   :  { %265 = vmatpush.xpose.msk.msra.mxu2 %vm73_vm0, %v37_v19  ;;  %266 = vmatpush.xpose.msk.msra.mxu3 %vm73_vm0, %v37_v19 }
  0x40   :  { %229 = vmatpush.xpose.msk.msra.mxu0 %vm73_vm0, %v37_v19 }
  0x43   :  { %267 = vmatpush.xpose.msk.msra.mxu2 %vm73_vm0, %v36_v20  ;;  %268 = vmatpush.xpose.msk.msra.mxu3 %vm73_vm0, %v36_v20 }
  0x44   :  { %230 = vmatpush.xpose.msk.msra.mxu0 %vm73_vm0, %v36_v20 }
  0x46   :  { %232 = vmatmul.msk.f32.vlgmr.msra.gmra.mxu2 %vm73_vm0, %v53_v21  ;;  %233 = vmatmul.msk.f32.vlgmr.msra.gmra.mxu3 %vm73_vm0, %v54_v22 }
  0x47   :  { %231 = vmatmul.msk.f32.vlgmr.msra.gmra.mxu0 %vm73_vm0, %v52_v23 }
  0x6a   :  { %v172_v42 = vpop.permute.xlu2 %171 }
  0x7c   :  { %v71_v25 = vpop.permute.xlu0 %70  ;;  %v61_v28 = vpop.permute.xlu1 %60 }
  0x84   :  { %v66_v27 = vpop.permute.xlu0 %65  ;;  %v167_v39 = vpop.permute.xlu1 %166 }
  0xc4   :  { %v148_v26 = vpop.f32.mrf.mxu0 }
  0xc5   :  { %v149_v33 = vadd.f32 %v148_v26, %v61_v28 }
  0xc7   :  { %v157_v36 = vmax.f32 %v149_v33, 0.0 }
  0xc9   :  { %v151_v29 = vpop.f32.mrf.mxu2  ;;  %v154_v30 = vpop.f32.mrf.mxu3 }
  0xca   :  { %v152_v31 = vadd.f32 %v151_v29, %v66_v27  ;;  %v155_v32 = vadd.f32 %v154_v30, %v71_v25 }
  0xcc   :  { %v159_v34 = vmax.f32 %v155_v32, 0.0  ;;  %v158_v35 = vmax.f32 %v152_v31, 0.0 }
  0xce   :  { %234 = vmatpush.msk.msra.mxu1 %vm181_vm1, %v159_v34 }
  0xd0   :  { %199 = vmatpush.msra.mxu1 %v158_v35 }
  0xd2   :  { %200 = vmatpush.msra.mxu1 %v157_v36 }
  0xd3   :  { %235 = vmatmul.msk.f32.vlgmr.msra.gmra.mxu1 %vm174_vm2, %v160_v37 }
  0xdb   :  { %236 = vmatmul.msk.f32.gmra.mxu1 %vm174_vm2, %v161_v38 }
 0x150   :  { %v202_v40 = vpop.f32.mrf.mxu1 }
 0x151   :  { %v203_v41 = vadd.f32 %v202_v40, %v167_v39 }
 0x153   :  { %208 = vst [vmem:[%s431_s5] sm:$0xff] %v203_v41 }
 0x158   :  { %v205_v43 = vpop.f32.mrf.mxu1 }
 0x159   :  { %v206_v44 = vadd.f32 %v205_v43, %v172_v42 }
 0x15b   :  { %209 = vst [vmem:[%s431_s5 + $0x8] sm:$0x3] %v206_v44 }
 0x15c   :  { %214 = vsyncpa [#allocation3], 1 }

</bundles_post_ra>
